<compile_context>
chip_gen: v6e
topology: v6e:2x2x1
jax: 0.10.0
libtpu: 0.0.40
codegen_flags: <defaults>
</compile_context>

<pallas_src>
import jax
import jax.numpy as jnp
from jax import lax
from jax.experimental import pallas as pl
from jax.experimental.pallas import tpu as pltpu

_LANE = 128
_SUBLANE = 8


def _round_up(x, m):
    return ((x + m - 1) // m) * m


def _vmem_capacity_bytes():
    try:
        return int(pltpu.get_tpu_info().vmem_capacity_bytes)
    except Exception:
        return 64 << 20  # conservative: v7x per-TensorCore VMEM


def _pick_batch_tile(B, L, out_dim, in_bytes, out_bytes, lane_out):
    """Largest batch tile that fits the VMEM budget (double-buffered blocks)."""
    budget = int(_vmem_capacity_bytes() * 0.6)  # headroom for weight/bias/scratch
    l_pad = _round_up(L, _LANE)                 # minor dim pads lanes to 128
    if lane_out:
        # output block (TB, out_dim): out_dim on lanes
        out_per_row = _round_up(out_dim, _LANE) * out_bytes
    else:
        # output block (out_dim, TB): out_dim on sublanes, batch on lanes
        out_per_row = _round_up(out_dim, _SUBLANE) * out_bytes
    per_row = 2 * l_pad * in_bytes + 2 * out_per_row
    tb = max(_LANE, (budget // per_row // _LANE) * _LANE)
    tb = min(tb, 8192)                          # diminishing returns beyond this
    if tb >= B:
        if B > 2 * _LANE:
            # Keep >=2 grid steps so v7x's 2 TensorCores both get work.
            tb = _round_up(pl.cdiv(B, 2), _LANE)
            if tb >= B:
                tb = B
        else:
            tb = B
    return tb


def _dlinear_kernel_lane_batch(x_ref, w_ref, b_ref, o_ref):
    # x: (TB, L)  w: (out_dim, L) torch layout  b: (out_dim, 1)  o: (out_dim, TB)
    acc = lax.dot_general(
        w_ref[...], x_ref[...],
        dimension_numbers=(((1,), (1,)), ((), ())),   # contract L with L: W @ X^T
        preferred_element_type=jnp.float32)
    o_ref[...] = (acc + b_ref[...]).astype(o_ref.dtype)


def _dlinear_kernel_lane_out(x_ref, wt_ref, b_ref, o_ref):
    # x: (TB, L)  wt: (L, out_dim)  b: (1, out_dim)  o: (TB, out_dim)
    acc = jnp.dot(x_ref[...], wt_ref[...], preferred_element_type=jnp.float32)
    o_ref[...] = (acc + b_ref[...]).astype(o_ref.dtype)


def dlinear_forward(x, weight, bias, *, batch_tile=None, compute_dtype=None,
                    min_pallas_rows=128):
    """DLinear forward: x (..., L), weight (out_dim, L) in PyTorch layout,
    bias (out_dim,). Returns (..., out_dim) = x @ W.T + b."""
    *lead, L = x.shape
    out_dim, l_w = weight.shape
    assert l_w == L and bias.shape == (out_dim,)
    out_dtype = x.dtype

    x2 = x.reshape(-1, L)                        # flatten all leading dims to rows
    B = x2.shape[0]

    # Opt-in reduced-precision inputs (HBM-bound kernel); f32 accumulation kept.
    if compute_dtype is not None:
        x2 = x2.astype(compute_dtype)
        weight = weight.astype(compute_dtype)

    if B < min_pallas_rows:
        # Tiny problems: XLA's fused GEMV beats a one-step pallas_call.
        out = (jnp.einsum("bl,ol->bo", x2, weight,
                          preferred_element_type=jnp.float32)
               + bias.astype(jnp.float32)).astype(out_dtype)
        return out.reshape(*lead, out_dim)

    in_bytes = jnp.dtype(x2.dtype).itemsize
    out_bytes = jnp.dtype(out_dtype).itemsize
    lane_out = out_dim >= _LANE                  # wide head: put out_dim on lanes

    if batch_tile is None:
        TB = _pick_batch_tile(B, L, out_dim, in_bytes, out_bytes, lane_out)
    else:
        TB = _round_up(batch_tile, _LANE)
        if TB >= B:
            TB = B

    grid = (pl.cdiv(B, TB),)                     # ragged last block handled by Pallas
    compiler_params = pltpu.CompilerParams(
        dimension_semantics=("parallel",),       # megacore split on v7x
        vmem_limit_bytes=int(_vmem_capacity_bytes() * 3 // 4))
    cost = pl.CostEstimate(
        flops=2 * B * L * out_dim,
        transcendentals=0,
        bytes_accessed=(in_bytes * (B * L + out_dim * L)
                        + out_bytes * (B * out_dim + out_dim)))

    if not lane_out:
        # Lane-dense batch output: (out_dim, TB), unmasked vst, weight resident.
        bias_col = bias.reshape(out_dim, 1).astype(jnp.float32)
        out_t = pl.pallas_call(
            _dlinear_kernel_lane_batch,
            out_shape=jax.ShapeDtypeStruct((out_dim, B), out_dtype),
            grid=grid,
            in_specs=[
                pl.BlockSpec((TB, L), lambda i: (i, 0)),        # x row-tile
                pl.BlockSpec((out_dim, L), lambda i: (0, 0)),   # weight (resident)
                pl.BlockSpec((out_dim, 1), lambda i: (0, 0)),   # bias column
            ],
            out_specs=pl.BlockSpec((out_dim, TB), lambda i: (0, i)),
            compiler_params=compiler_params,
            cost_estimate=cost,
        )(x2, weight, bias_col)
        if out_dim == 1:
            out = out_t.reshape(B, 1)            # free relayout of a (1, B) row
        else:
            out = out_t.T                        # small: out_dim < 128
    else:
        # Lane-dense out_dim output: (TB, out_dim), no wrapper transpose.
        w_t = weight.T                           # tiny (L, out_dim), once per call
        bias_row = bias.reshape(1, out_dim).astype(jnp.float32)
        out = pl.pallas_call(
            _dlinear_kernel_lane_out,
            out_shape=jax.ShapeDtypeStruct((B, out_dim), out_dtype),
            grid=grid,
            in_specs=[
                pl.BlockSpec((TB, L), lambda i: (i, 0)),        # x row-tile
                pl.BlockSpec((L, out_dim), lambda i: (0, 0)),   # W^T (resident)
                pl.BlockSpec((1, out_dim), lambda i: (0, 0)),   # bias row
            ],
            out_specs=pl.BlockSpec((TB, out_dim), lambda i: (i, 0)),
            compiler_params=compiler_params,
            cost_estimate=cost,
        )(x2, w_t, bias_row)

    return out.reshape(*lead, out_dim)


if __name__ == "__main__":
    key = jax.random.PRNGKey(0)
    kx1, kx2, kx3, kx4, kw, kb, kw2, kb2 = jax.random.split(key, 8)

    input_len = 32
    output_dim = 1

    # nn.Linear default init: U[-1/sqrt(L), 1/sqrt(L)]
    bound = 1.0 / (input_len ** 0.5)
    weight = jax.random.uniform(kw, (output_dim, input_len), jnp.float32,
                                minval=-bound, maxval=bound)
    bias = jax.random.uniform(kb, (output_dim,), jnp.float32,
                              minval=-bound, maxval=bound)

    # Case 1: (batch, channels, L) = (16, 16, 32) -> 256 rows, explicit
    # batch_tile=128 -> 2 parallel grid steps through the Pallas kernel.
    x1 = jax.random.normal(kx1, (16, 16, input_len), jnp.float32)
    out1 = jax.block_until_ready(dlinear_forward(x1, weight, bias, batch_tile=128))
    ref1 = x1 @ weight.T + bias
    assert out1.shape == (16, 16, output_dim)
    assert jnp.allclose(out1, ref1, atol=2e-5, rtol=2e-5)

    # Case 2: ragged grid (200 rows, tile 128 -> last block is partial).
    x2 = jax.random.normal(kx2, (20, 10, input_len), jnp.float32)
    out2 = jax.block_until_ready(dlinear_forward(x2, weight, bias, batch_tile=128))
    ref2 = x2 @ weight.T + bias
    assert out2.shape == (20, 10, output_dim)
    assert jnp.allclose(out2, ref2, atol=2e-5, rtol=2e-5)

    # Case 3: tiny batch (8 rows) -> fused-einsum fallback path.
    x3 = jax.random.normal(kx3, (2, 4, input_len), jnp.float32)
    out3 = jax.block_until_ready(dlinear_forward(x3, weight, bias))
    ref3 = x3 @ weight.T + bias
    assert out3.shape == (2, 4, output_dim)
    assert jnp.allclose(out3, ref3, atol=2e-5, rtol=2e-5)

    # Case 4: wide head (out_dim = 128) -> lane-dense (TB, out_dim) orientation,
    # auto (VMEM-derived) batch tile.
    out_dim_w = 128
    weight_w = jax.random.uniform(kw2, (out_dim_w, input_len), jnp.float32,
                                  minval=-bound, maxval=bound)
    bias_w = jax.random.uniform(kb2, (out_dim_w,), jnp.float32,
                                minval=-bound, maxval=bound)
    x4 = jax.random.normal(kx4, (256, input_len), jnp.float32)
    out4 = jax.block_until_ready(dlinear_forward(x4, weight_w, bias_w))
    ref4 = x4 @ weight_w.T + bias_w
    assert out4.shape == (256, out_dim_w)
    assert jnp.allclose(out4, ref4, atol=2e-5, rtol=2e-5)

    print("KERNEL_OK")
</pallas_src>

<mosaic_0001>
module attributes {stable_mosaic.version = 11 : i64} {
  func.func @_dlinear_kernel_lane_batch(%arg0: i32, %arg1: memref<128x32xf32, #tpu.memory_space<vmem>>, %arg2: memref<1x32xf32, #tpu.memory_space<vmem>>, %arg3: memref<1x1xf32, #tpu.memory_space<vmem>>, %arg4: memref<1x128xf32, #tpu.memory_space<vmem>>) attributes {dimension_semantics = [#tpu.dimension_semantics<parallel>], iteration_bounds = array<i64: 2>, scalar_prefetch = 0 : i64, scratch_operands = 0 : i64, tpu.core_type = #tpu.core_type<tc>, window_params = [{transform_indices = @transform_0, window_bounds = array<i64: 128, 32>}, {pipeline_mode = #tpu.pipeline_mode<synchronous>, transform_indices = @transform_1, window_bounds = array<i64: 1, 32>}, {pipeline_mode = #tpu.pipeline_mode<synchronous>, transform_indices = @transform_2, window_bounds = array<i64: 1, 1>}, {transform_indices = @transform_3, window_bounds = array<i64: 1, 128>}]} {
    %c0 = arith.constant 0 : index
    %c0_0 = arith.constant 0 : index
    %0 = vector.load %arg2[%c0, %c0_0] : memref<1x32xf32, #tpu.memory_space<vmem>>, vector<1x32xf32>
    %c0_1 = arith.constant 0 : index
    %c0_2 = arith.constant 0 : index
    %1 = vector.load %arg1[%c0_1, %c0_2] : memref<128x32xf32, #tpu.memory_space<vmem>>, vector<128x32xf32>
    %cst = arith.constant dense<0.000000e+00> : vector<1x128xf32>
    %2 = tpu.matmul %0, %1, %cst {dimension_numbers = #tpu.dot_dimension_numbers<[1], [1], [0], [0], [0, 0, 1, 0], [], []>} : vector<1x32xf32>, vector<128x32xf32>, vector<1x128xf32> -> vector<1x128xf32>
    %c0_3 = arith.constant 0 : index
    %c0_4 = arith.constant 0 : index
    %3 = vector.load %arg3[%c0_3, %c0_4] : memref<1x1xf32, #tpu.memory_space<vmem>>, vector<1x1xf32>
    %4 = vector.broadcast %3 : vector<1x1xf32> to vector<1x128xf32>
    %5 = arith.addf %2, %4 : vector<1x128xf32>
    %c0_5 = arith.constant 0 : index
    %c0_6 = arith.constant 0 : index
    %6 = vector.load %arg4[%c0_5, %c0_6] : memref<1x128xf32, #tpu.memory_space<vmem>>, vector<1x128xf32>
    tpu.vector_store %arg4[%c0_5, %c0_6], %5 {strides = array<i32>} : memref<1x128xf32, #tpu.memory_space<vmem>>, vector<1x128xf32>,
    return
  }
  func.func @transform_0(%arg0: i32) -> (i32, i32) {
    %c0_i32 = arith.constant 0 : i32
    %c0_i32_0 = arith.constant 0 : i32
    return %arg0, %c0_i32 : i32, i32
  }
  func.func @transform_1(%arg0: i32) -> (i32, i32) {
    %c0_i32 = arith.constant 0 : i32
    %c0_i32_0 = arith.constant 0 : i32
    %c0_i32_1 = arith.constant 0 : i32
    return %c0_i32, %c0_i32_0 : i32, i32
  }
  func.func @transform_2(%arg0: i32) -> (i32, i32) {
    %c0_i32 = arith.constant 0 : i32
    %c0_i32_0 = arith.constant 0 : i32
    %c0_i32_1 = arith.constant 0 : i32
    return %c0_i32, %c0_i32_0 : i32, i32
  }
  func.func @transform_3(%arg0: i32) -> (i32, i32) {
    %c0_i32 = arith.constant 0 : i32
    %c0_i32_0 = arith.constant 0 : i32
    return %c0_i32, %arg0 : i32, i32
  }
}

</mosaic_0001>

<bundles_post_ra>
// kernel: tpu_custom_call.1
= control target key start
LH: loop header
LB: loop body
LE: loop exit
PB: predicated region body
PF: predicated region fallthrough
CT: control target
= control target key end

     0   :  { %s730_s0 = inlined_call_operand.vmem [shape: f32[256,32], index: 0, kind: input, shape index: {}]   ;;  %s731_s1 = inlined_call_operand.vmem [shape: f32[1,32], index: 1, kind: input, shape index: {}]   ;;  %s732_s2 = inlined_call_operand.<no memory space> [shape: f32[1,1], index: 2, kind: input, shape index: {}]   ;;  %s733_s3 = inlined_call_operand.hbm [shape: f32[1,256], index: 3, kind: output, shape index: {}]  }
   0x1   :  { %v8_v0 = vstv %s732_s2 }
   0x2   :  { %9 = vst [vmem:[#allocation2] sm:$0x1] %v8_v0 }
   0x3   :  { %10 = vsyncpa [#allocation4], 0 }
   0x4   :  { %12 = vsyncpa [#allocation4 + $0x1], 0  ;;  %s600_s14 = smov 0   ;;  %s602_s15 = smov 0  }
   0x5   :  { %s604_s16 = smov 0   ;;  %s606_s17 = smov 0  }
   0x6 LB: > { %s389_s2 = sadd.s32 4294967295, %s571_s17   ;;  %s390_s18 = sadd.s32 4294967294, %s571_s17   ;;  %s571_s17 = sphi %s606_s17, %s739_s17   ;;  %s567_s16 = sphi %s604_s16, %s738_s16   ;;  %s563_s15 = sphi %s602_s15, %s737_s15   ;;  %s559_s14 = sphi %s600_s14, %s736_s14  }
   0x7   : > { %s623_s19 = sadd.s32 1, %s571_s17   ;;  %s93_s20 = sadd.s32 1, %s567_s16 }
   0x8   : > { %s90_s21 = ssub.s32 %s571_s17, %s623_s19  ;;  %p103_p0 = scmp.ne.s32.totalorder %s567_s16, %s563_s15 }
   0x9   : > { %p91_p1 = scmp.eq.s32.totalorder %s90_s21, 0  ;;  %p104_p2 = scmp.eq.s32.totalorder %s389_s2, 1 }
   0xa   : > { %p109_p3 = scmp.ne.s32.totalorder %s563_s15, %s559_s14  ;;  %p110_p4 = scmp.eq.s32.totalorder %s390_s18, 1 }
   0xb   : > { %s633_s22 = scalar_select %p91_p1, %s567_s16, %s93_s20  }
   0xc   : > { %p635_p5 = por %p104_p2, %p103_p0  ;;  %p639_p6 = por %p110_p4, %p109_p3 }
   0xd   : > { %p393_p7 = scmp.ge.s32.totalorder %s571_s17, 1  ;;  %p143_p8 = scmp.lt.s32.totalorder %s571_s17, 3 }
   0xf   : > { %p144_p9 = pnand %p393_p7, %p143_p8 }
  0x10   : > { %s645_s25 = sshll.u32 (!%p144_p9), %s389_s2, 4  ;;  %s164_s6 = sand.u32 (!%p144_p9), 1, %s563_s15  }
  0x11   : > { %147 = sbr.rel (%p144_p9) target bundleno = 298 (0x12a), region = 32  ;;  %p167_p10 = scmp.lt.s32.totalorder (!%p144_p9), %s645_s25, 31 }
  0x12   : > { %s165_s7 = scalar_lea.vmem (!%p144_p9), [#allocation3], %s164_s6  ;;  %s695_s11 = scalar_lea.hbm (!%p144_p9), %s733_s3, %s645_s25 }
  0x13   : > { %s335_s8 = sshll.u32 (!%p144_p9), %s165_s7, 4  ;;  %s323_s12 = scalar_lea.sflag (!%p144_p9), [#allocation4], %s164_s6  ;;  %s336_s8 = int_to_ptr.vmem [resolvable:$true] %s335_s8 }
  0x14   : > { %s511_s13 = scalar_lea.vmem (!%p144_p9), %s336_s8, 16  ;;  %s576_s2 = smov (!%p144_p9), [#allocation3]  }
  0x15   : > { %p512_p11 = scmp.ne.s32.totalorder (!%p144_p9), %s336_s8, %s511_s13  ;;  %s515_s18 = sshll.u32 (!%p144_p9), %s576_s2, 4  ;;  %s516_s18 = int_to_ptr.vmem [resolvable:$false] %s515_s18 }
  0x16   : > { %v573_v1 = vmov 0.0   ;;  %vm574_vm0 = vmmov 0   ;;  %v189_v2 = vld [vmem:[#allocation2] sm:$0x1]  ;;  %v575_v3 = vmov 0   ;;  %s168_s26 = scalar_select %p167_p10, %s645_s25, 31  ;;  %v195_v21 = vlaneseq }
  0x17   : > { %433 = vmatprep.subr.mxu0 %v573_v1  ;;  %465 = vmatprep.mubr.msk.f32.mxu0 %vm574_vm0, %v573_v1  ;;  %vm199_vm1 = vcmask 261120   ;;  %v172_v20 = vld [vmem:[%s731_s1] sm:$0x1]  ;;  %p513_p12 = pnand %p512_p11, %p635_p5  ;;  %s517_s20 = scalar_lea.vmem %s516_s18, 32 }
  0x18   : > { %510 = vset.pattern.permute.xlu0 %v575_v3  ;;  %s395_s27 = sshll.u32 %s168_s26, 3  ;;  %v196_v22 = vshrl.u32 %v195_v21, 7  ;;  %p518_p0 = scmp.lt.s32.totalorder %s336_s8, %s516_s18 }
  0x19   : > { %192 = vperm.xlu0 %510, %v189_v2   ;;  %s652_s30 = scalar_lea.vmem %s730_s0, %s395_s27  ;;  %p514_p13 = pneg %p513_p12 }
  0x1a   : > { %v188_v4 = vld [vmem:[%s652_s30 + $0x78] sm:$0xff]  ;;  %v187_v5 = vld [vmem:[%s652_s30 + $0x70] sm:$0xff]  ;;  %v186_v6 = vld [vmem:[%s652_s30 + $0x68] sm:$0xff]  ;;  %v197_v23 = vsub.s32 0, %v196_v22  ;;  %p519_p1 = scmp.lt.s32.totalorder %s517_s20, %s511_s13 }
  0x1b   : > { %434 = vmatpush3.xpose.msk.msra.mxu0 %vm199_vm1, %v188_v4  ;;  %v185_v7 = vld [vmem:[%s652_s30 + $0x60] sm:$0xff]  ;;  %v184_v8 = vld [vmem:[%s652_s30 + $0x58] sm:$0xff]  ;;  %v183_v9 = vld [vmem:[%s652_s30 + $0x50] sm:$0xff] }
  0x1c   : > { %435 = vmatprep.subr.mxu0 %v573_v1  ;;  %v182_v10 = vld [vmem:[%s652_s30 + $0x48] sm:$0xff]  ;;  %v181_v11 = vld [vmem:[%s652_s30 + $0x40] sm:$0xff]  ;;  %v180_v12 = vld [vmem:[%s652_s30 + $0x38] sm:$0xff]  ;;  %p520_p2 = por %p519_p1, %p518_p0 }
  0x1d   : > { %v179_v13 = vld [vmem:[%s652_s30 + $0x30] sm:$0xff]  ;;  %v178_v14 = vld [vmem:[%s652_s30 + $0x28] sm:$0xff]  ;;  %v177_v15 = vld [vmem:[%s652_s30 + $0x20] sm:$0xff] }
  0x1e   : > { %v176_v16 = vld [vmem:[%s652_s30 + $0x18] sm:$0xff]  ;;  %v175_v17 = vld [vmem:[%s652_s30 + $0x10] sm:$0xff]  ;;  %v174_v18 = vld [vmem:[%s652_s30 + $0x8] sm:$0xff]  ;;  %p521_p3 = pnand %p520_p2, %p514_p13 }
  0x1f   : > { %436 = vmatpush3.xpose.msk.msra.mxu0 %vm199_vm1, %v187_v5  ;;  %v173_v19 = vld [vmem:[%s652_s30] sm:$0xff] }
  0x20   : > { %437 = vmatprep.subr.mxu0 %v573_v1 }
  0x23   : > { %438 = vmatpush3.xpose.msk.msra.mxu0 %vm199_vm1, %v186_v6 }
  0x24   : > { %439 = vmatprep.subr.mxu0 %v573_v1 }
  0x27   : > { %440 = vmatpush3.xpose.msk.msra.mxu0 %vm199_vm1, %v185_v7 }
  0x28   : > { %441 = vmatprep.subr.mxu0 %v573_v1 }
  0x2b   : > { %442 = vmatpush3.xpose.msk.msra.mxu0 %vm199_vm1, %v184_v8 }
  0x2c   : > { %443 = vmatprep.subr.mxu0 %v573_v1 }
  0x2f   : > { %444 = vmatpush3.xpose.msk.msra.mxu0 %vm199_vm1, %v183_v9 }
  0x30   : > { %445 = vmatprep.subr.mxu0 %v573_v1 }
  0x33   : > { %446 = vmatpush3.xpose.msk.msra.mxu0 %vm199_vm1, %v182_v10 }
  0x34   : > { %447 = vmatprep.subr.mxu0 %v573_v1 }
  0x37   : > { %448 = vmatpush3.xpose.msk.msra.mxu0 %vm199_vm1, %v181_v11 }
  0x38   : > { %449 = vmatprep.subr.mxu0 %v573_v1 }
  0x3b   : > { %450 = vmatpush3.xpose.msk.msra.mxu0 %vm199_vm1, %v180_v12 }
  0x3c   : > { %451 = vmatprep.subr.mxu0 %v573_v1 }
  0x3f   : > { %452 = vmatpush3.xpose.msk.msra.mxu0 %vm199_vm1, %v179_v13 }
  0x40   : > { %453 = vmatprep.subr.mxu0 %v573_v1 }
  0x43   : > { %454 = vmatpush3.xpose.msk.msra.mxu0 %vm199_vm1, %v178_v14 }
  0x44   : > { %455 = vmatprep.subr.mxu0 %v573_v1 }
  0x47   : > { %456 = vmatpush3.xpose.msk.msra.mxu0 %vm199_vm1, %v177_v15 }
  0x48   : > { %457 = vmatprep.subr.mxu0 %v573_v1 }
  0x4b   : > { %458 = vmatpush3.xpose.msk.msra.mxu0 %vm199_vm1, %v176_v16 }
  0x4c   : > { %459 = vmatprep.subr.mxu0 %v573_v1 }
  0x4f   : > { %460 = vmatpush3.xpose.msk.msra.mxu0 %vm199_vm1, %v175_v17 }
  0x50   : > { %461 = vmatprep.subr.mxu0 %v573_v1 }
  0x53   : > { %462 = vmatpush3.xpose.msk.msra.mxu0 %vm199_vm1, %v174_v18 }
  0x54   : > { %463 = vmatprep.subr.mxu0 %v573_v1 }
  0x57   : > { %464 = vmatpush3.xpose.msk.msra.mxu0 %vm199_vm1, %v173_v19 }
  0x5a   : > { %466 = vmatmul.mubr.msk.f32.vlgmr.msra.gmra.mxu0 %vm199_vm1, %v172_v20 }
  0x94   : > { %v193_v24 = vpop.permute.xlu0 %192 }
  0x95   : > { %v198_v25 = vrot.slane %v193_v24, %v197_v23 }
 0x11a   : > { %v317_v26 = vpop.f32.mrf.mxu0 }
 0x11b   : > { %v318_v27 = vadd.f32 %v317_v26, %v198_v25 }
 0x11c   : > { %v467_v28 = vpop.f32.mrf.mxu0 }
 0x11d   : > { %321 = vst [vmem:[%s165_s7] sm:$0x1] %v318_v27 }
 0x11e   : > { %524 = shalt.err (!%p521_p3)
}
 0x11f   : > { %s525_s21 = scalar_lea.hbm %s695_s11, 16  ;;  %s529_s27 = scalar_lea.hbm %s733_s3, 32 }
 0x120   : > { %p526_p4 = scmp.ne.s32.totalorder %s695_s11, %s525_s21  ;;  %p530_p9 = scmp.lt.s32.totalorder %s695_s11, %s733_s3 }
 0x121   : > { %p531_p10 = scmp.lt.s32.totalorder %s529_s27, %s525_s21 }
 0x122   : > { %p527_p7 = pnand %p526_p4, %p635_p5 }
 0x123   : > { %p532_p11 = por %p531_p10, %p530_p9 }
 0x124   : > { %p528_p8 = pneg %p527_p7 }
 0x126   : > { %p533_p12 = pnand %p532_p11, %p528_p8 }
 0x128   : > { %536 = shalt.err (!%p533_p12)
}
 0x129   : > { %468 = dma.vmem_to_hbm [thread:$0]  (%p635_p5), %s336_s8, 16, %s695_s11, %s323_s12  }
 0x12a PF: > { %p474_p13 = scmp.ge.s32.totalorder %s571_s17, 2  ;;  %s347_s30 = sand.u32 1, %s559_s14  }
 0x12b   : > { %s348_s4 = scalar_lea.sflag [#allocation4], %s347_s30 }
 0x12c   : > { %p471_p0 = pnand %p474_p13, %p639_p6 }
 0x12e   : > { %p472_p1 = pneg %p471_p0 }
 0x130   : > { %554 = dma.done.wait (%p472_p1), %s348_s4, 16  }
 0x131   : > { %556 = vsyncadd (%p472_p1), %s348_s4, 4294967280  ;;  %p15_p2 = scmp.ge.s32.totalorder %s623_s19, 4   ;;  %s736_s14 = smov %s563_s15 }
 0x132   : > { %s737_s15 = smov %s567_s16  ;;  %s738_s16 = smov %s633_s22 }
 0x133   : > { %s739_s17 = smov %s623_s19  ;;  %17 = sbr.rel (!%p15_p2) target bundleno = 6 (0x6), region = 67 }
 0x138   :  { %352 = vsyncpa [#allocation4], 1 }
 0x139   :  { %354 = vsyncpa [#allocation4 + $0x1], 1 }

</bundles_post_ra>
